<compile_context>
chip_gen: v5e
topology: v5e:2x2
jax: 0.10.0
libtpu: 0.0.40
codegen_flags: <defaults>
</compile_context>

<pallas_src>
import math

import jax
import jax.numpy as jnp
from jax import lax
from jax.experimental import pallas as pl
from jax.experimental.pallas import tpu as pltpu

_VMEM_LIMIT = 48 * 1024 * 1024  # headroom below v7x's 64 MiB physical VMEM


# ---------------------------------------------------------------------------
# Kernel 1: masked-sum pooling (pipelined over S) + Linear + BatchNorm1d
#           + L2 feature normalization (hoisted out of kernel 2)
# ---------------------------------------------------------------------------
def _features_kernel(emb_ref, mask_ref, inv_len_ref, wc_ref, bc_ref,
                     gamma_ref, beta_ref, out_ref, acc_ref):
    s = pl.program_id(0)

    @pl.when(s == 0)
    def _():
        acc_ref[...] = jnp.zeros_like(acc_ref)

    emb = emb_ref[...].astype(jnp.float32)              # [B, ts, H]
    m3 = mask_ref[...].astype(jnp.float32)              # [B, ts, 1]
    acc_ref[...] += jnp.sum(emb * m3, axis=1)           # [B, H]

    @pl.when(s == pl.num_programs(0) - 1)
    def _():
        # mean pooling (inv_len = 1 / clamp(sum(mask), 1e-9) precomputed)
        pooled = acc_ref[...] * inv_len_ref[...]        # [B, H]
        # dropout(p=0.0) is identity; classifier Linear
        x = jnp.dot(pooled, wc_ref[...],
                    preferred_element_type=jnp.float32) + bc_ref[...]  # [B, F]
        # BatchNorm1d, training mode (biased batch variance, eps=1e-5)
        mean = jnp.mean(x, axis=0, keepdims=True)
        var = jnp.mean((x - mean) ** 2, axis=0, keepdims=True)
        y = gamma_ref[...] * (x - mean) * lax.rsqrt(var + 1e-5) + beta_ref[...]
        # F.normalize(y) (eps=1e-12) done once here instead of per class tile
        inv_norm = lax.rsqrt(jnp.maximum(
            jnp.sum(y * y, axis=1, keepdims=True), 1e-24))
        out_ref[...] = y * inv_norm


def shopee_normalized_features(token_emb, mask, w_cls, b_cls, gamma, beta,
                               *, ts=None):
    """Returns L2-normalized post-BN features, shape [B, F]."""
    B, S, H = token_emb.shape
    F = w_cls.shape[0]                                  # w_cls: [F, H]
    if ts is None:
        ts = 64 if S % 64 == 0 else (8 if S % 8 == 0 else S)
    assert S % ts == 0, "sequence tile must divide S"

    mask_f = mask.astype(jnp.float32)
    mask3 = mask_f.reshape(B, S, 1)
    inv_len = 1.0 / jnp.maximum(mask_f.sum(axis=1, keepdims=True), 1e-9)
    wc = jnp.transpose(w_cls)                           # [H, F]
    bc = b_cls.reshape(1, F)
    g = gamma.reshape(1, F)
    bt = beta.reshape(1, F)

    return pl.pallas_call(
        _features_kernel,
        out_shape=jax.ShapeDtypeStruct((B, F), jnp.float32),
        grid_spec=pltpu.PrefetchScalarGridSpec(
            num_scalar_prefetch=0,
            grid=(S // ts,),
            in_specs=[
                pl.BlockSpec((B, ts, H), lambda s: (0, s, 0)),
                pl.BlockSpec((B, ts, 1), lambda s: (0, s, 0)),
                pl.BlockSpec((B, 1), lambda s: (0, 0)),
                pl.BlockSpec((H, F), lambda s: (0, 0)),
                pl.BlockSpec((1, F), lambda s: (0, 0)),
                pl.BlockSpec((1, F), lambda s: (0, 0)),
                pl.BlockSpec((1, F), lambda s: (0, 0)),
            ],
            out_specs=pl.BlockSpec((B, F), lambda s: (0, 0)),
            scratch_shapes=[pltpu.VMEM((B, H), jnp.float32)],
        ),
        compiler_params=pltpu.CompilerParams(
            dimension_semantics=("arbitrary",),         # carried accumulator
            vmem_limit_bytes=_VMEM_LIMIT),
    )(token_emb, mask3, inv_len, wc, bc, g, bt)


# ---------------------------------------------------------------------------
# Kernel 2: ArcMarginProduct + per-tile softmax stats, class axis "parallel"
# ---------------------------------------------------------------------------
def _make_arcmargin_kernel(scale, margin, num_classes):
    cos_m = math.cos(margin)
    sin_m = math.sin(margin)
    th = math.cos(math.pi - margin)
    mm = math.sin(math.pi - margin) * margin

    def kernel(xn_ref, w_ref, label_ref, logits_ref, tmax_ref, tsum_ref,
               ttgt_ref):
        j = pl.program_id(0)
        B = xn_ref.shape[0]
        TC = w_ref.shape[1]

        # features and weight arrive pre-L2-normalized; weight pre-transposed
        # to [F, tc] so the MXU sees its natural [B,K]x[K,N] layout.
        cosine = jnp.dot(xn_ref[...], w_ref[...],
                         preferred_element_type=jnp.float32)     # [B, TC]
        sine = jnp.sqrt(jnp.maximum(1.0 - cosine * cosine, 0.0))  # clamp->no NaN
        phi = cosine * cos_m - sine * sin_m
        phi = jnp.where(cosine > th, phi, cosine - mm)

        class_ids = j * TC + lax.broadcasted_iota(jnp.int32, (B, TC), 1)
        one_hot = (class_ids == label_ref[...]).astype(jnp.float32)
        out = (one_hot * phi + (1.0 - one_hot) * cosine) * scale
        # padded classes (class axis rounded up to the tile size) -> -inf-ish
        out = jnp.where(class_ids < num_classes, out, -1e30)
        logits_ref[...] = out

        # independent per-tile softmax stats (finalized in the wrapper); keeps
        # the class sweep "parallel" so it can split across TensorCores.
        row_max = jnp.max(out, axis=1, keepdims=True)             # [B, 1]
        row_sum = jnp.sum(jnp.exp(out - row_max), axis=1, keepdims=True)
        row_tgt = jnp.sum(one_hot * out, axis=1, keepdims=True)
        tmax_ref[...] = row_max.reshape(1, B, 1)
        tsum_ref[...] = row_sum.reshape(1, B, 1)
        ttgt_ref[...] = row_tgt.reshape(1, B, 1)

    return kernel


def arc_margin(features_n, weight, labels, *, scale=30.0, margin=0.8, tc=512):
    """features_n: [B, F] already L2-normalized. weight: [C, F]. Returns
    (scaled logits [B, C], mean cross-entropy loss)."""
    B, F = features_n.shape
    C = weight.shape[0]
    assert tc % 128 == 0
    n_tiles = pl.cdiv(C, tc)
    C_pad = n_tiles * tc

    # one-time O(C*F) prep in XLA: row-normalize + transpose + pad class axis.
    # TODO(synk): for v5e HBM-bandwidth relief this weight could be cast to
    # bf16 (MXU-native); kept f32 here for bit-tight correctness checking.
    wn = weight * lax.rsqrt(jnp.maximum(
        jnp.sum(weight * weight, axis=1, keepdims=True), 1e-24))
    wnt = jnp.transpose(wn)                                      # [F, C]
    if C_pad != C:
        wnt = jnp.pad(wnt, ((0, 0), (0, C_pad - C)))
    labels2d = labels.reshape(B, 1).astype(jnp.int32)

    kernel = _make_arcmargin_kernel(scale, margin, C)
    logits_p, tmax, tsum, ttgt = pl.pallas_call(
        kernel,
        out_shape=(
            jax.ShapeDtypeStruct((B, C_pad), jnp.float32),
            jax.ShapeDtypeStruct((n_tiles, B, 1), jnp.float32),
            jax.ShapeDtypeStruct((n_tiles, B, 1), jnp.float32),
            jax.ShapeDtypeStruct((n_tiles, B, 1), jnp.float32),
        ),
        grid_spec=pltpu.PrefetchScalarGridSpec(
            num_scalar_prefetch=0,
            grid=(n_tiles,),
            in_specs=[
                pl.BlockSpec((B, F), lambda j: (0, 0)),
                pl.BlockSpec((F, tc), lambda j: (0, j)),
                pl.BlockSpec((B, 1), lambda j: (0, 0)),
            ],
            out_specs=[
                pl.BlockSpec((B, tc), lambda j: (0, j)),
                pl.BlockSpec((1, B, 1), lambda j: (j, 0, 0)),
                pl.BlockSpec((1, B, 1), lambda j: (j, 0, 0)),
                pl.BlockSpec((1, B, 1), lambda j: (j, 0, 0)),
            ],
        ),
        compiler_params=pltpu.CompilerParams(
            dimension_semantics=("parallel",),
            vmem_limit_bytes=_VMEM_LIMIT),
    )(features_n, wnt, labels2d)

    logits = logits_p[:, :C]

    # finalize CrossEntropyLoss from the tiny per-tile stats (plain JAX).
    tmax = tmax[..., 0]                                          # [n_tiles, B]
    tsum = tsum[..., 0]
    ttgt = ttgt[..., 0]
    g_max = jnp.max(tmax, axis=0)                                # [B]
    denom = jnp.sum(tsum * jnp.exp(tmax - g_max[None, :]), axis=0)
    lse = g_max + jnp.log(denom)
    target = jnp.sum(ttgt, axis=0)
    loss = jnp.mean(lse - target)
    return logits, loss


# ---------------------------------------------------------------------------
# Plain-JAX reference (for a sanity check)
# ---------------------------------------------------------------------------
def _reference(token_emb, mask, w_cls, b_cls, gamma, beta, w_arc, labels,
               scale, margin):
    hi = jax.lax.Precision.HIGHEST
    m3 = mask[:, :, None]
    pooled = (token_emb * m3).sum(1) / jnp.maximum(m3.sum(1), 1e-9)
    x = jnp.dot(pooled, w_cls.T, precision=hi) + b_cls
    mean = x.mean(0)
    var = ((x - mean) ** 2).mean(0)
    y = gamma * (x - mean) / jnp.sqrt(var + 1e-5) + beta
    xn = y / jnp.maximum(jnp.linalg.norm(y, axis=1, keepdims=True), 1e-12)
    wn = w_arc / jnp.maximum(jnp.linalg.norm(w_arc, axis=1, keepdims=True), 1e-12)
    cos = jnp.dot(xn, wn.T, precision=hi)
    sin = jnp.sqrt(jnp.maximum(1.0 - cos * cos, 0.0))
    phi = cos * math.cos(margin) - sin * math.sin(margin)
    phi = jnp.where(cos > math.cos(math.pi - margin), phi,
                    cos - math.sin(math.pi - margin) * margin)
    oh = jax.nn.one_hot(labels, w_arc.shape[0], dtype=jnp.float32)
    out = (oh * phi + (1.0 - oh) * cos) * scale
    lse = jax.scipy.special.logsumexp(out, axis=1)
    loss = jnp.mean(lse - out[jnp.arange(out.shape[0]), labels])
    return out, loss


if __name__ == "__main__":
    # Small shapes consistent with the module
    # (real: B=16, S=128, H=768, fc_dim=768, classes=11014).
    B, S, H, F, C = 8, 16, 128, 128, 640
    SCALE, MARGIN = 30.0, 0.8

    key = jax.random.PRNGKey(0)
    k = jax.random.split(key, 6)

    # "Backbone outputs": token embeddings + attention mask
    token_emb = jax.random.normal(k[0], (B, S, H), jnp.float32)
    lengths = jax.random.randint(k[1], (B,), 1, S + 1)
    mask = (jnp.arange(S)[None, :] < lengths[:, None]).astype(jnp.float32)
    labels = jax.random.randint(k[2], (B,), 0, C)

    # Deterministic parameter init (matching the module's init schemes)
    w_cls = jax.random.normal(k[3], (F, H), jnp.float32) * math.sqrt(2.0 / (H + F))
    b_cls = jnp.zeros((F,), jnp.float32)
    gamma = jnp.ones((F,), jnp.float32)
    beta = jnp.zeros((F,), jnp.float32)
    limit = math.sqrt(6.0 / (C + F))
    w_arc = jax.random.uniform(k[4], (C, F), jnp.float32, -limit, limit)

    feats_n = shopee_normalized_features(token_emb, mask, w_cls, b_cls, gamma,
                                         beta, ts=8)
    logits, loss = arc_margin(feats_n, w_arc, labels, scale=SCALE,
                              margin=MARGIN, tc=512)
    jax.block_until_ready((feats_n, logits, loss))

    ref_logits, ref_loss = _reference(token_emb, mask, w_cls, b_cls, gamma,
                                      beta, w_arc, labels, SCALE, MARGIN)
    assert jnp.allclose(logits, ref_logits, atol=5e-2, rtol=5e-2), "logits mismatch"
    assert jnp.allclose(loss, ref_loss, atol=5e-2, rtol=5e-2), "loss mismatch"

    print("KERNEL_OK")
</pallas_src>

<mosaic_0001>
module attributes {stable_mosaic.version = 11 : i64} {
  func.func @_features_kernel(%arg0: i32, %arg1: memref<8x8x128xf32, #tpu.memory_space<vmem>>, %arg2: memref<8x8x1xf32, #tpu.memory_space<vmem>>, %arg3: memref<8x1xf32, #tpu.memory_space<vmem>>, %arg4: memref<128x128xf32, #tpu.memory_space<vmem>>, %arg5: memref<1x128xf32, #tpu.memory_space<vmem>>, %arg6: memref<1x128xf32, #tpu.memory_space<vmem>>, %arg7: memref<1x128xf32, #tpu.memory_space<vmem>>, %arg8: memref<8x128xf32, #tpu.memory_space<vmem>>, %arg9: memref<8x128xf32, #tpu.memory_space<vmem>>) attributes {dimension_semantics = [#tpu.dimension_semantics<arbitrary>], iteration_bounds = array<i64: 2>, scalar_prefetch = 0 : i64, scratch_operands = 1 : i64, tpu.core_type = #tpu.core_type<tc>, window_params = [{transform_indices = @transform_0, window_bounds = array<i64: 8, 8, 128>}, {transform_indices = @transform_1, window_bounds = array<i64: 8, 8, 1>}, {pipeline_mode = #tpu.pipeline_mode<synchronous>, transform_indices = @transform_2, window_bounds = array<i64: 8, 1>}, {pipeline_mode = #tpu.pipeline_mode<synchronous>, transform_indices = @transform_3, window_bounds = array<i64: 128, 128>}, {pipeline_mode = #tpu.pipeline_mode<synchronous>, transform_indices = @transform_4, window_bounds = array<i64: 1, 128>}, {pipeline_mode = #tpu.pipeline_mode<synchronous>, transform_indices = @transform_5, window_bounds = array<i64: 1, 128>}, {pipeline_mode = #tpu.pipeline_mode<synchronous>, transform_indices = @transform_6, window_bounds = array<i64: 1, 128>}, {pipeline_mode = #tpu.pipeline_mode<synchronous>, transform_indices = @transform_7, window_bounds = array<i64: 8, 128>}]} {
    %c0_i32 = arith.constant 0 : i32
    %0 = arith.cmpi eq, %arg0, %c0_i32 : i32
    %1 = arith.extui %0 : i1 to i32
    %c0_i32_0 = arith.constant 0 : i32
    %2 = arith.cmpi ne, %1, %c0_i32_0 : i32
    scf.if %2 {
      %cst_11 = arith.constant 0.000000e+00 : f32
      %14 = vector.broadcast %cst_11 : f32 to vector<8x128xf32>
      %c0_12 = arith.constant 0 : index
      %c0_13 = arith.constant 0 : index
      %15 = vector.load %arg9[%c0_12, %c0_13] : memref<8x128xf32, #tpu.memory_space<vmem>>, vector<8x128xf32>
      tpu.vector_store %arg9[%c0_12, %c0_13], %14 {strides = array<i32>} : memref<8x128xf32, #tpu.memory_space<vmem>>, vector<8x128xf32>,
    } else {
    }
    %c0 = arith.constant 0 : index
    %c0_1 = arith.constant 0 : index
    %c0_2 = arith.constant 0 : index
    %3 = vector.load %arg1[%c0, %c0_1, %c0_2] : memref<8x8x128xf32, #tpu.memory_space<vmem>>, vector<8x8x128xf32>
    %c0_3 = arith.constant 0 : index
    %c0_4 = arith.constant 0 : index
    %c0_5 = arith.constant 0 : index
    %4 = vector.load %arg2[%c0_3, %c0_4, %c0_5] : memref<8x8x1xf32, #tpu.memory_space<vmem>>, vector<8x8x1xf32>
    %c0_6 = arith.constant 0 : index
    %c0_7 = arith.constant 0 : index
    %5 = vector.load %arg9[%c0_6, %c0_7] : memref<8x128xf32, #tpu.memory_space<vmem>>, vector<8x128xf32>
    %6 = vector.broadcast %4 : vector<8x8x1xf32> to vector<8x8x128xf32>
    %7 = arith.mulf %3, %6 : vector<8x8x128xf32>
    %cst = arith.constant dense<0.000000e+00> : vector<8x128xf32>
    %8 = vector.multi_reduction <add>, %7, %cst [1] : vector<8x8x128xf32> to vector<8x128xf32>
    %9 = arith.addf %5, %8 : vector<8x128xf32>
    %c0_8 = arith.constant 0 : index
    %c0_9 = arith.constant 0 : index
    %10 = vector.load %arg9[%c0_8, %c0_9] : memref<8x128xf32, #tpu.memory_space<vmem>>, vector<8x128xf32>
    tpu.vector_store %arg9[%c0_8, %c0_9], %9 {strides = array<i32>} : memref<8x128xf32, #tpu.memory_space<vmem>>, vector<8x128xf32>,
    %c1_i32 = arith.constant 1 : i32
    %11 = arith.cmpi eq, %arg0, %c1_i32 : i32
    %12 = arith.extui %11 : i1 to i32
    %c0_i32_10 = arith.constant 0 : i32
    %13 = arith.cmpi ne, %12, %c0_i32_10 : i32
    scf.if %13 {
      %c0_11 = arith.constant 0 : index
      %c0_12 = arith.constant 0 : index
      %14 = vector.load %arg9[%c0_11, %c0_12] : memref<8x128xf32, #tpu.memory_space<vmem>>, vector<8x128xf32>
      %c0_13 = arith.constant 0 : index
      %c0_14 = arith.constant 0 : index
      %15 = vector.load %arg3[%c0_13, %c0_14] : memref<8x1xf32, #tpu.memory_space<vmem>>, vector<8x1xf32>
      %16 = vector.broadcast %15 : vector<8x1xf32> to vector<8x128xf32>
      %17 = arith.mulf %14, %16 : vector<8x128xf32>
      %c0_15 = arith.constant 0 : index
      %c0_16 = arith.constant 0 : index
      %18 = vector.load %arg4[%c0_15, %c0_16] : memref<128x128xf32, #tpu.memory_space<vmem>>, vector<128x128xf32>
      %cst_17 = arith.constant dense<0.000000e+00> : vector<8x128xf32>
      %19 = tpu.matmul %17, %18, %cst_17 {dimension_numbers = #tpu.dot_dimension_numbers<[1], [0], [0], [1], [0, 0, 1, 1], [], []>} : vector<8x128xf32>, vector<128x128xf32>, vector<8x128xf32> -> vector<8x128xf32>
      %c0_18 = arith.constant 0 : index
      %c0_19 = arith.constant 0 : index
      %20 = vector.load %arg5[%c0_18, %c0_19] : memref<1x128xf32, #tpu.memory_space<vmem>>, vector<1x128xf32>
      %21 = vector.broadcast %20 : vector<1x128xf32> to vector<8x128xf32>
      %22 = arith.addf %19, %21 : vector<8x128xf32>
      %cst_20 = arith.constant dense<0.000000e+00> : vector<128xf32>
      %23 = vector.multi_reduction <add>, %22, %cst_20 [0] : vector<8x128xf32> to vector<128xf32>
      %24 = vector.shape_cast %23 : vector<128xf32> to vector<1x128xf32>
      %cst_21 = arith.constant 8.000000e+00 : f32
      %25 = vector.broadcast %cst_21 : f32 to vector<1x128xf32>
      %26 = arith.divf %24, %25 : vector<1x128xf32>
      %27 = vector.broadcast %26 : vector<1x128xf32> to vector<8x128xf32>
      %28 = arith.subf %22, %27 : vector<8x128xf32>
      %29 = arith.mulf %28, %28 : vector<8x128xf32>
      %cst_22 = arith.constant dense<0.000000e+00> : vector<128xf32>
      %30 = vector.multi_reduction <add>, %29, %cst_22 [0] : vector<8x128xf32> to vector<128xf32>
      %31 = vector.shape_cast %30 : vector<128xf32> to vector<1x128xf32>
      %cst_23 = arith.constant 8.000000e+00 : f32
      %32 = vector.broadcast %cst_23 : f32 to vector<1x128xf32>
      %33 = arith.divf %31, %32 : vector<1x128xf32>
      %c0_24 = arith.constant 0 : index
      %c0_25 = arith.constant 0 : index
      %34 = vector.load %arg6[%c0_24, %c0_25] : memref<1x128xf32, #tpu.memory_space<vmem>>, vector<1x128xf32>
      %35 = vector.broadcast %26 : vector<1x128xf32> to vector<8x128xf32>
      %36 = arith.subf %22, %35 : vector<8x128xf32>
      %37 = vector.broadcast %34 : vector<1x128xf32> to vector<8x128xf32>
      %38 = arith.mulf %37, %36 : vector<8x128xf32>
      %cst_26 = arith.constant 9.99999974E-6 : f32
      %39 = vector.broadcast %cst_26 : f32 to vector<1x128xf32>
      %40 = arith.addf %33, %39 : vector<1x128xf32>
      %41 = math.rsqrt %40 : vector<1x128xf32>
      %42 = vector.broadcast %41 : vector<1x128xf32> to vector<8x128xf32>
      %43 = arith.mulf %38, %42 : vector<8x128xf32>
      %c0_27 = arith.constant 0 : index
      %c0_28 = arith.constant 0 : index
      %44 = vector.load %arg7[%c0_27, %c0_28] : memref<1x128xf32, #tpu.memory_space<vmem>>, vector<1x128xf32>
      %45 = vector.broadcast %44 : vector<1x128xf32> to vector<8x128xf32>
      %46 = arith.addf %43, %45 : vector<8x128xf32>
      %47 = arith.mulf %46, %46 : vector<8x128xf32>
      %cst_29 = arith.constant dense<0.000000e+00> : vector<8xf32>
      %48 = vector.multi_reduction <add>, %47, %cst_29 [1] : vector<8x128xf32> to vector<8xf32>
      %49 = vector.shape_cast %48 : vector<8xf32> to vector<8x1xf32>
      %cst_30 = arith.constant 1.000000e-24 : f32
      %50 = vector.broadcast %cst_30 : f32 to vector<8x1xf32>
      %51 = arith.maximumf %49, %50 : vector<8x1xf32>
      %52 = math.rsqrt %51 : vector<8x1xf32>
      %53 = vector.broadcast %52 : vector<8x1xf32> to vector<8x128xf32>
      %54 = arith.mulf %46, %53 : vector<8x128xf32>
      %c0_31 = arith.constant 0 : index
      %c0_32 = arith.constant 0 : index
      %55 = vector.load %arg8[%c0_31, %c0_32] : memref<8x128xf32, #tpu.memory_space<vmem>>, vector<8x128xf32>
      tpu.vector_store %arg8[%c0_31, %c0_32], %54 {strides = array<i32>} : memref<8x128xf32, #tpu.memory_space<vmem>>, vector<8x128xf32>,
    } else {
    }
    return
  }
  func.func @transform_0(%arg0: i32) -> (i32, i32, i32) {
    %c0_i32 = arith.constant 0 : i32
    %c0_i32_0 = arith.constant 0 : i32
    %c0_i32_1 = arith.constant 0 : i32
    return %c0_i32, %arg0, %c0_i32_0 : i32, i32, i32
  }
  func.func @transform_1(%arg0: i32) -> (i32, i32, i32) {
    %c0_i32 = arith.constant 0 : i32
    %c0_i32_0 = arith.constant 0 : i32
    %c0_i32_1 = arith.constant 0 : i32
    return %c0_i32, %arg0, %c0_i32_0 : i32, i32, i32
  }
  func.func @transform_2(%arg0: i32) -> (i32, i32) {
    %c0_i32 = arith.constant 0 : i32
    %c0_i32_0 = arith.constant 0 : i32
    %c0_i32_1 = arith.constant 0 : i32
    return %c0_i32, %c0_i32_0 : i32, i32
  }
  func.func @transform_3(%arg0: i32) -> (i32, i32) {
    %c0_i32 = arith.constant 0 : i32
    %c0_i32_0 = arith.constant 0 : i32
    %c0_i32_1 = arith.constant 0 : i32
    return %c0_i32, %c0_i32_0 : i32, i32
  }
  func.func @transform_4(%arg0: i32) -> (i32, i32) {
    %c0_i32 = arith.constant 0 : i32
    %c0_i32_0 = arith.constant 0 : i32
    %c0_i32_1 = arith.constant 0 : i32
    return %c0_i32, %c0_i32_0 : i32, i32
  }
  func.func @transform_5(%arg0: i32) -> (i32, i32) {
    %c0_i32 = arith.constant 0 : i32
    %c0_i32_0 = arith.constant 0 : i32
    %c0_i32_1 = arith.constant 0 : i32
    return %c0_i32, %c0_i32_0 : i32, i32
  }
  func.func @transform_6(%arg0: i32) -> (i32, i32) {
    %c0_i32 = arith.constant 0 : i32
    %c0_i32_0 = arith.constant 0 : i32
    %c0_i32_1 = arith.constant 0 : i32
    return %c0_i32, %c0_i32_0 : i32, i32
  }
  func.func @transform_7(%arg0: i32) -> (i32, i32) {
    %c0_i32 = arith.constant 0 : i32
    %c0_i32_0 = arith.constant 0 : i32
    %c0_i32_1 = arith.constant 0 : i32
    return %c0_i32, %c0_i32_0 : i32, i32
  }
}

</mosaic_0001>

<bundles_post_ra>
// kernel: tpu_custom_call.1
= control target key start
LH: loop header
LB: loop body
LE: loop exit
PB: predicated region body
PF: predicated region fallthrough
CT: control target
= control target key end

     0   :  { %12 = vsyncpa [#allocation6], 0  ;;  %s1095_s0 = inlined_call_operand.vmem [shape: f32[8,16,128], index: 0, kind: input, shape index: {}]   ;;  %s1096_s1 = inlined_call_operand.vmem [shape: f32[8,16,1], index: 1, kind: input, shape index: {}]   ;;  %s1097_s2 = inlined_call_operand.vmem [shape: f32[8,1], index: 2, kind: input, shape index: {}]   ;;  %s1098_s3 = inlined_call_operand.hbm [shape: f32[128,128], index: 3, kind: input, shape index: {}]   ;;  %s1099_s4 = inlined_call_operand.vmem [shape: f32[1,128], index: 4, kind: input, shape index: {}]   ;;  %s1100_s5 = inlined_call_operand.vmem [shape: f32[1,128], index: 5, kind: input, shape index: {}]   ;;  %s1101_s6 = inlined_call_operand.vmem [shape: f32[1,128], index: 6, kind: input, shape index: {}]   ;;  %s1102_s7 = inlined_call_operand.hbm [shape: f32[8,128], index: 7, kind: output, shape index: {}]  }
   0x1   :  { %13 = vsyncpa [#allocation7], 0  ;;  %s985_s24 = smov 0   ;;  %s987_s25 = smov 0  }
   0x2   :  { %s989_s26 = smov 0  }
   0x3 LB: > { %s1001_s27 = sadd.s32 4294967295, %s935_s26   ;;  %s1004_s28 = sadd.s32 1, %s935_s26   ;;  %s935_s26 = sphi %s989_s26, %s1107_s26   ;;  %s931_s25 = sphi %s987_s25, %s1106_s25   ;;  %s927_s24 = sphi %s985_s24, %s1105_s24  }
   0x4   : > { %s23_s29 = ssub.s32 %s935_s26, %s1004_s28  ;;  %s26_s30 = sadd.s32 1, %s931_s25 }
   0x5   : > { %p24_p0 = scmp.eq.s32.totalorder %s23_s29, 0  ;;  %p33_p1 = scmp.ne.s32.totalorder %s931_s25, %s927_s24 }
   0x6   : > { %p34_p2 = scmp.eq.s32.totalorder %s935_s26, 0  ;;  %p769_p3 = scmp.ge.s32.totalorder %s935_s26, 1 }
   0x7   : > { %s1014_s8 = scalar_select %p24_p0, %s931_s25, %s26_s30  }
   0x8   : > { %p1016_p4 = por %p34_p2, %p33_p1  ;;  %p202_p5 = scmp.lt.s32.totalorder %s935_s26, 3 }
   0x9   : > { %p770_p6 = scmp.ne.s32.totalorder %s1001_s27, 0  ;;  %p798_p7 = scmp.eq.s32.totalorder %s1001_s27, 0 }
   0xa   : > { %p1023_p8 = pnand %p769_p3, %p202_p5  ;;  %s216_s13 = sshll.u32 %s1098_s3, 4  ;;  %s217_s13 = int_to_ptr.hbm [resolvable:$true] %s216_s13 }
   0xb   : > { %s937_s14 = smov [#allocation5]   ;;  %s938_s16 = smov 128  }
   0xc   : > { %p794_p9 = pneg %p1023_p8  ;;  %s218_s15 = sshll.u32 %s937_s14, 4  ;;  %s219_s15 = int_to_ptr.vmem [resolvable:$true] %s218_s15 }
   0xd   : > { %s939_s17 = smov 8   ;;  %p771_p11 = scmp.ge.s32.totalorder %s935_s26, 2 }
   0xe   : > { %p795_p10 = pnand %p798_p7, %p794_p9 }
   0xf   : > { %237 = sbr.rel (%p771_p11) target bundleno = 44 (0x2c), region = 36 }
  0x10   : > { %797 = dma.hbm_to_vmem [thread:$0]  (!%p795_p10), %s217_s13, 2048, %s219_s15, [#allocation6], %s938_s16, %s938_s16, %s939_s17  }
  0x14   : > { %240 = sbr.rel (!%p1016_p4) target bundleno = 32 (0x20), region = 40  ;;  %s242_s18 = sand.u32 (%p1016_p4), 1, %s931_s25  }
  0x15   : > { %s773_s19 = sshll.u32 (%p1016_p4), %s935_s26, 3  ;;  %s772_s20 = sshll.u32 (%p1016_p4), %s242_s18, 6 }
  0x16   : > { %s246_s23 = scalar_lea.vmem (%p1016_p4), %s1095_s0, %s773_s19  ;;  %s244_s29 = scalar_lea.vmem (%p1016_p4), [#allocation3], %s772_s20 }
  0x17   : > { %v289_v0 = vld [vmem:[%s246_s23] sm:$0xff] (%p1016_p4)  ;;  %v291_v1 = vld [vmem:[%s246_s23 + $0x10] sm:$0xff] (%p1016_p4) }
  0x18   : > { %v293_v2 = vld [vmem:[%s246_s23 + $0x20] sm:$0xff] (%p1016_p4)  ;;  %290 = vst [vmem:[%s244_s29] sm:$0xff] (%p1016_p4), %v289_v0  ;;  %v295_v3 = vld [vmem:[%s246_s23 + $0x30] sm:$0xff] (%p1016_p4) }
  0x19   : > { %292 = vst [vmem:[%s244_s29 + $0x8] sm:$0xff] %v291_v1  ;;  %v297_v4 = vld [vmem:[%s246_s23 + $0x40] sm:$0xff]  ;;  %v299_v5 = vld [vmem:[%s246_s23 + $0x50] sm:$0xff] }
  0x1a   : > { %294 = vst [vmem:[%s244_s29 + $0x10] sm:$0xff] %v293_v2  ;;  %v301_v6 = vld [vmem:[%s246_s23 + $0x60] sm:$0xff]  ;;  %v303_v7 = vld [vmem:[%s246_s23 + $0x70] sm:$0xff] }
  0x1b   : > { %296 = vst [vmem:[%s244_s29 + $0x18] sm:$0xff] %v295_v3 }
  0x1c   : > { %298 = vst [vmem:[%s244_s29 + $0x20] sm:$0xff] %v297_v4 }
  0x1d   : > { %300 = vst [vmem:[%s244_s29 + $0x28] sm:$0xff] %v299_v5 }
  0x1e   : > { %302 = vst [vmem:[%s244_s29 + $0x30] sm:$0xff] %v301_v6 }
  0x1f   : > { %304 = vst [vmem:[%s244_s29 + $0x38] sm:$0xff] %v303_v7 }
  0x20 PF: > { %310 = sbr.rel (!%p1016_p4) target bundleno = 44 (0x2c), region = 78  ;;  %s312_s30 = sand.u32 (%p1016_p4), 1, %s931_s25  }
  0x21   : > { %s775_s11 = sshll.u32 (%p1016_p4), %s935_s26, 3  ;;  %s774_s12 = sshll.u32 (%p1016_p4), %s312_s30, 6 }
  0x22   : > { %s316_s15 = scalar_lea.vmem (%p1016_p4), %s1096_s1, %s775_s11  ;;  %s314_s16 = scalar_lea.vmem (%p1016_p4), [#allocation4], %s774_s12 }
  0x23   : > { %v359_v8 = vld [vmem:[%s316_s15] sm:$0xff] (%p1016_p4)  ;;  %v361_v9 = vld [vmem:[%s316_s15 + $0x10] sm:$0xff] (%p1016_p4) }
  0x24   : > { %v363_v10 = vld [vmem:[%s316_s15 + $0x20] sm:$0xff] (%p1016_p4)  ;;  %360 = vst [vmem:[%s314_s16] sm:$0xff] (%p1016_p4), %v359_v8  ;;  %v365_v11 = vld [vmem:[%s316_s15 + $0x30] sm:$0xff] (%p1016_p4) }
  0x25   : > { %362 = vst [vmem:[%s314_s16 + $0x8] sm:$0xff] %v361_v9  ;;  %v367_v12 = vld [vmem:[%s316_s15 + $0x40] sm:$0xff]  ;;  %v369_v13 = vld [vmem:[%s316_s15 + $0x50] sm:$0xff] }
  0x26   : > { %364 = vst [vmem:[%s314_s16 + $0x10] sm:$0xff] %v363_v10  ;;  %v371_v14 = vld [vmem:[%s316_s15 + $0x60] sm:$0xff]  ;;  %v373_v15 = vld [vmem:[%s316_s15 + $0x70] sm:$0xff] }
  0x27   : > { %366 = vst [vmem:[%s314_s16 + $0x18] sm:$0xff] %v365_v11 }
  0x28   : > { %368 = vst [vmem:[%s314_s16 + $0x20] sm:$0xff] %v367_v12 }
  0x29   : > { %370 = vst [vmem:[%s314_s16 + $0x28] sm:$0xff] %v369_v13 }
  0x2a   : > { %372 = vst [vmem:[%s314_s16 + $0x30] sm:$0xff] %v371_v14 }
  0x2b   : > { %374 = vst [vmem:[%s314_s16 + $0x38] sm:$0xff] %v373_v15 }
  0x2c PF: > { %383 = sbr.rel (%p1023_p8) target bundleno = 658 (0x292), region = 116  ;;  %s386_s26 = sand.u32 (!%p1023_p8), 1, %s927_s24  }
  0x2d   : > { %s777_s9 = sshll.u32 (!%p1023_p8), %s386_s26, 6 }
  0x2e   : > { %s1052_s17 = scalar_lea.vmem (!%p1023_p8), [#allocation3], %s777_s9  ;;  %s395_s18 = scalar_lea.vmem (!%p1023_p8), [#allocation4], %s777_s9 }
  0x31   : > { %918 = dma.done.wait (%p798_p7), [#allocation6], 2048  }
  0x32   : > { %920 = vsyncadd (%p798_p7), [#allocation6], 4294965248  ;;  %431 = sbr.rel (%p770_p6) target bundleno = 57 (0x39), region = 132 }
  0x37   : > { %v940_v16 = vmov 0.0  }
  0x38   : > { %432 = vst [vmem:[#allocation2] sm:$0xff] %v940_v16 }
  0x39 PF: > { %v443_v17 = vld [vmem:[%s395_s18 + $0x10] sm:$0xff]  ;;  %v441_v18 = vld [vmem:[%s395_s18] sm:$0xff]  ;;  %v941_v19 = vmov 0   ;;  %v444_v21 = vld [vmem:[%s395_s18 + $0x18] sm:$0xff]  ;;  %vm554_vm0 = vcmask 1041409   ;;  %vm556_vm1 = vcmask 1042434  }
  0x3a   : > { %835 = vset.pattern.permute.xlu1 %v941_v19  ;;  %834 = vset.pattern.permute.xlu0 %v941_v19  ;;  %v445_v20 = vld [vmem:[%s395_s18 + $0x20] sm:$0xff]  ;;  %v442_v22 = vld [vmem:[%s395_s18 + $0x8] sm:$0xff]  ;;  %v448_v24 = vld [vmem:[%s395_s18 + $0x38] sm:$0xff]  ;;  %vm558_vm2 = vcmask 1043459   ;;  %vm560_vm3 = vcmask 1044484   ;;  %vm562_vm4 = vcmask 1045509  }
  0x3b   : > { %462 = vperm.xlu1 %835, %v443_v17   ;;  %452 = vperm.xlu0 %834, %v441_v18   ;;  %v446_v23 = vld [vmem:[%s395_s18 + $0x28] sm:$0xff]  ;;  %v447_v25 = vld [vmem:[%s395_s18 + $0x30] sm:$0xff]  ;;  %v437_v27 = vld [vmem:[%s1052_s17 + $0x20] sm:$0xff]  ;;  %vm564_vm5 = vcmask 1046534   ;;  %vm566_vm6 = vcmask 1047559   ;;  %p781_p12 = scmp.ne.s32.totalorder %s1001_s27, 1 }
  0x3c   : > { %836 = vset.pattern.permute.xlu2 %v941_v19  ;;  %v435_v28 = vld [vmem:[%s1052_s17 + $0x10] sm:$0xff]  ;;  %v433_v29 = vld [vmem:[%s1052_s17] sm:$0xff]  ;;  %v438_v36 = vld [vmem:[%s1052_s17 + $0x28] sm:$0xff] }
  0x3d   : > { %472 = vperm.xlu2 %836, %v445_v20   ;;  %v436_v43 = vld [vmem:[%s1052_s17 + $0x18] sm:$0xff]  ;;  %v434_v44 = vld [vmem:[%s1052_s17 + $0x8] sm:$0xff]  ;;  %v439_v62 = vld [vmem:[%s1052_s17 + $0x30] sm:$0xff] }
  0x3e   : > { %v440_v61 = vld [vmem:[%s1052_s17 + $0x38] sm:$0xff] }
  0x43   : > { %467 = vperm.xlu1 %835, %v444_v21   ;;  %457 = vperm.xlu0 %834, %v442_v22  }
  0x45   : > { %477 = vperm.xlu2 %836, %v446_v23  }
  0x4b   : > { %487 = vperm.xlu1 %835, %v448_v24   ;;  %482 = vperm.xlu0 %834, %v447_v25  }
  0x97   : > { %v473_v26 = vpop.permute.xlu2 %472 }
  0x98   : > { %v494_v30 = vmul.f32 %v473_v26, %v437_v27 }
  0x9a   : > { %v522_v39 = vrot.slane %v494_v30, 4 }
  0x9c   : > { %v523_v45 = vadd.f32 %v522_v39, %v494_v30 }
  0x9e   : > { %v524_v55 = vrot.slane %v523_v45, 2 }
  0x9f   : > { %v478_v35 = vpop.permute.xlu2 %477 }
  0xa0   : > { %v495_v40 = vmul.f32 %v478_v35, %v438_v36  ;;  %v525_v1 = vadd.f32 %v524_v55, %v523_v45 }
  0xa2   : > { %v528_v47 = vrot.slane %v495_v40, 4  ;;  %v526_v15 = vrot.slane %v525_v1, 1 }
  0xa4   : > { %v529_v57 = vadd.f32 %v528_v47, %v495_v40 }
  0xa6   : > { %v530_v3 = vrot.slane %v529_v57, 2 }
  0xa8   : > { %v531_v16 = vadd.f32 %v530_v3, %v529_v57 }
  0xaa   : > { %v532_v26 = vrot.slane %v531_v16, 1 }
  0xac   : > { %v533_v35 = vadd.f32 %v532_v26, %v531_v16 }
  0xad   : > { %v463_v31 = vpop.permute.xlu1 %462  ;;  %v453_v32 = vpop.permute.xlu0 %452 }
  0xae   : > { %v492_v33 = vmul.f32 %v463_v31, %v435_v28  ;;  %v490_v34 = vmul.f32 %v453_v32, %v433_v29  ;;  %v527_v28 = vadd.f32 %v526_v15, %v525_v1 }
  0xb0   : > { %v510_v37 = vrot.slane %v492_v33, 4  ;;  %v498_v38 = vrot.slane %v490_v34, 4 }
  0xb2   : > { %v499_v41 = vadd.f32 %v498_v38, %v490_v34  ;;  %v511_v42 = vadd.f32 %v510_v37, %v492_v33  ;;  %v449_v38 = vld [vmem:[#allocation2] sm:$0xff] }
  0xb4   : > { %v500_v46 = vrot.slane %v499_v41, 2  ;;  %v512_v52 = vrot.slane %v511_v42, 2 }
  0xb5   : > { %v468_v48 = vpop.permute.xlu1 %467  ;;  %v458_v49 = vpop.permute.xlu0 %457 }
  0xb6   : > { %v493_v50 = vmul.f32 %v468_v48, %v436_v43  ;;  %v491_v51 = vmul.f32 %v458_v49, %v434_v44  ;;  %v501_v56 = vadd.f32 %v500_v46, %v499_v41  ;;  %v513_v60 = vadd.f32 %v512_v52, %v511_v42 }
  0xb8   : > { %v516_v53 = vrot.slane %v493_v50, 4  ;;  %v504_v54 = vrot.slane %v491_v51, 4  ;;  %v502_v2 = vrot.slane %v501_v56, 1  ;;  %v514_v10 = vrot.slane %v513_v60, 1 }
  0xba   : > { %v517_v58 = vadd.f32 %v516_v53, %v493_v50  ;;  %v505_v59 = vadd.f32 %v504_v54, %v491_v51  ;;  %v503_v17 = vadd.f32 %v502_v2, %v501_v56  ;;  %v515_v21 = vadd.f32 %v514_v10, %v513_v60 }
  0xbc   : > { %v518_v63 = vrot.slane %v517_v58, 2  ;;  %v506_v0 = vrot.slane %v505_v59, 2 }
  0xbd   : > { %v488_v4 = vpop.permute.xlu1 %487  ;;  %v483_v5 = vpop.permute.xlu0 %482 }
  0xbe   : > { %v519_v6 = vadd.f32 %v518_v63, %v517_v58  ;;  %v507_v7 = vadd.f32 %v506_v0, %v505_v59  ;;  %v497_v8 = vmul.f32 %v488_v4, %v440_v61  ;;  %v496_v9 = vmul.f32 %v483_v5, %v439_v62 }
  0xc0   : > { %v520_v11 = vrot.slane %v519_v6, 1  ;;  %v508_v12 = vrot.slane %v507_v7, 1  ;;  %v540_v13 = vrot.slane %v497_v8, 4  ;;  %v534_v14 = vrot.slane %v496_v9, 4 }
  0xc2   : > { %v509_v18 = vadd.f32 %v508_v12, %v507_v7  ;;  %v541_v19 = vadd.f32 %v540_v13, %v497_v8  ;;  %v535_v20 = vadd.f32 %v534_v14, %v496_v9  ;;  %v521_v22 = vadd.f32 %v520_v11, %v519_v6 }
  0xc4   : > { %v555_v23 = vsel %vm554_vm0, %v509_v18, %v503_v17  ;;  %v542_v24 = vrot.slane %v541_v19, 2  ;;  %v536_v25 = vrot.slane %v535_v20, 2 }
  0xc5   : > { %v557_v27 = vsel %vm556_vm1, %v515_v21, %v555_v23 }
  0xc6   : > { %v559_v29 = vsel %vm558_vm2, %v521_v22, %v557_v27  ;;  %v543_v30 = vadd.f32 %v542_v24, %v541_v19  ;;  %v537_v31 = vadd.f32 %v536_v25, %v535_v20 }
  0xc7   : > { %v561_v34 = vsel %vm560_vm3, %v527_v28, %v559_v29 }
  0xc8   : > { %v544_v32 = vrot.slane %v543_v30, 1  ;;  %v538_v33 = vrot.slane %v537_v31, 1  ;;  %v563_v39 = vsel %vm562_vm4, %v533_v35, %v561_v34 }
  0xca   : > { %v545_v36 = vadd.f32 %v544_v32, %v543_v30  ;;  %v539_v37 = vadd.f32 %v538_v33, %v537_v31 }
  0xcc   : > { %v565_v40 = vsel %vm564_vm5, %v539_v37, %v563_v39  ;;  %574 = sbr.rel (%p781_p12) target bundleno = 653 (0x28d), region = 136 }
  0xcd   : > { %v567_v41 = vsel %vm566_vm6, %v545_v36, %v565_v40 }
  0xce   : > { %v569_v42 = vadd.f32 %v567_v41, %v449_v38 }
  0xd0   : > { %570 = vst [vmem:[#allocation2] sm:$0xff] %v569_v42 }
  0xd1   : > { %v576_v43 = vld [vmem:[%s1097_s2] sm:$0xff]  ;;  %v597_v45 = vld [vmem:[#allocation5 + $0x70] sm:$0xff]  ;;  %v942_v46 = vmov 0   ;;  %v596_v47 = vld [vmem:[#allocation5 + $0x68] sm:$0xff]  ;;  %v943_v0 = vmov 8.0  }
  0xd2   : > { %v598_v44 = vld [vmem:[#allocation5 + $0x78] sm:$0xff]  ;;  %837 = vset.pattern.permute.xlu0 %v942_v46  ;;  %v595_v48 = vld [vmem:[#allocation5 + $0x60] sm:$0xff]  ;;  %v593_v50 = vld [vmem:[#allocation5 + $0x50] sm:$0xff]  ;;  %841 = vrcp.f32 %v943_v0 }
  0xd3   : > { %603 = vmatpush.msra.mxu0 %v598_v44  ;;  %579 = vperm.xlu0 %837, %v576_v43   ;;  %v594_v49 = vld [vmem:[#allocation5 + $0x58] sm:$0xff]  ;;  %v592_v51 = vld [vmem:[#allocation5 + $0x48] sm:$0xff]  ;;  %v591_v52 = vld [vmem:[#allocation5 + $0x40] sm:$0xff] }
  0xd4   : > { %v590_v53 = vld [vmem:[#allocation5 + $0x38] sm:$0xff]  ;;  %v589_v54 = vld [vmem:[#allocation5 + $0x30] sm:$0xff]  ;;  %v588_v55 = vld [vmem:[#allocation5 + $0x28] sm:$0xff] }
  0xd5   : > { %604 = vmatpush.msra.mxu0 %v597_v45  ;;  %v587_v56 = vld [vmem:[#allocation5 + $0x20] sm:$0xff]  ;;  %v586_v57 = vld [vmem:[#allocation5 + $0x18] sm:$0xff]  ;;  %v585_v58 = vld [vmem:[#allocation5 + $0x10] sm:$0xff] }
  0xd6   : > { %v584_v59 = vld [vmem:[#allocation5 + $0x8] sm:$0xff]  ;;  %v583_v60 = vld [vmem:[#allocation5] sm:$0xff]  ;;  %v838_v3 = vld [vmem:[%s1099_s4] ss:$0 sm:$0xff] }
  0xd7   : > { %605 = vmatpush.msra.mxu0 %v596_v47  ;;  %v575_v61 = vld [vmem:[#allocation2] sm:$0xff] }
  0xd8   : > { %v842_v1 = vpop.eup %841  ;;  %v839_v31 = vld [vmem:[%s1100_s5] ss:$0 sm:$0xff] }
  0xd9   : > { %606 = vmatpush.msra.mxu0 %v595_v48  ;;  %v630_v2 = vmul.f32 8.0, %v842_v1  ;;  %vm634_vm7 = vweird.f32 %v842_v1  ;;  %v840_v35 = vld [vmem:[%s1101_s6] ss:$0 sm:$0xff] }
  0xdb   : > { %607 = vmatpush.msra.mxu0 %v594_v49  ;;  %v631_v5 = vsub.f32 1.0, %v630_v2 }
  0xdd   : > { %608 = vmatpush.msra.mxu0 %v593_v50  ;;  %v632_v8 = vmul.f32 %v842_v1, %v631_v5 }
  0xdf   : > { %609 = vmatpush.msra.mxu0 %v592_v51  ;;  %v633_v11 = vadd.f32 %v842_v1, %v632_v8 }
  0xe1   : > { %610 = vmatpush.msra.mxu0 %v591_v52  ;;  %v635_v14 = vsel %vm634_vm7, %v842_v1, %v633_v11 }
  0xe3   : > { %611 = vmatpush.msra.mxu0 %v590_v53 }
  0xe5   : > { %612 = vmatpush.msra.mxu0 %v589_v54 }
  0xe7   : > { %613 = vmatpush.msra.mxu0 %v588_v55 }
  0xe9   : > { %614 = vmatpush.msra.mxu0 %v587_v56 }
  0xeb   : > { %615 = vmatpush.msra.mxu0 %v586_v57 }
  0xed   : > { %616 = vmatpush.msra.mxu0 %v585_v58 }
  0xef   : > { %617 = vmatpush.msra.mxu0 %v584_v59 }
  0xf1   : > { %618 = vmatpush.msra.mxu0 %v583_v60 }
 0x145   : > { %v580_v62 = vpop.permute.xlu0 %579 }
 0x146   : > { %v582_v63 = vmul.f32 %v580_v62, %v575_v61 }
 0x148   : > { %619 = vmatmul.f32.vlgmr.msra.gmra.mxu0 %v582_v63 }
 0x1c5   : > { %v620_v4 = vpop.f32.mrf.mxu0 }
 0x1c6   : > { %v621_v6 = vadd.f32 %v838_v3, %v620_v4 }
 0x1c8   : > { %v623_v7 = vrot.slane %v621_v6, 4 }
 0x1ca   : > { %v624_v9 = vadd.f32 %v623_v7, %v621_v6 }
 0x1cc   : > { %v625_v10 = vrot.slane %v624_v9, 2 }
 0x1ce   : > { %v626_v12 = vadd.f32 %v625_v10, %v624_v9 }
 0x1d0   : > { %v627_v13 = vrot.slane %v626_v12, 1 }
 0x1d2   : > { %v628_v15 = vadd.f32 %v627_v13, %v626_v12 }
 0x1d4   : > { %v636_v16 = vmul.f32 %v635_v14, %v628_v15 }
 0x1d6   : > { %v637_v17 = vsub.f32 %v621_v6, %v636_v16 }
 0x1d8   : > { %v638_v18 = vmul.f32 %v637_v17, %v637_v17  ;;  %v650_v34 = vmul.f32 %v839_v31, %v637_v17 }
 0x1da   : > { %v639_v19 = vrot.slane %v638_v18, 4 }
 0x1dc   : > { %v640_v20 = vadd.f32 %v639_v19, %v638_v18 }
 0x1de   : > { %v641_v21 = vrot.slane %v640_v20, 2 }
 0x1e0   : > { %v642_v22 = vadd.f32 %v641_v21, %v640_v20 }
 0x1e2   : > { %v643_v23 = vrot.slane %v642_v22, 1 }
 0x1e4   : > { %v644_v24 = vadd.f32 %v643_v23, %v642_v22 }
 0x1e6   : > { %v645_v25 = vmul.f32 %v644_v24, %v635_v14 }
 0x1e8   : > { %v651_v26 = vadd.f32 1e-05, %v645_v25 }
 0x1ea   : > { %843 = vrsqrt.f32 %v651_v26  ;;  %vm658_vm9 = vweird.f32 %v651_v26 }
 0x1f0   : > { %v844_v27 = vpop.eup %843 }
 0x1f1   : > { %v653_v28 = vmul.f32 %v844_v27, %v651_v26  ;;  %vm659_vm8 = vweird.f32 %v844_v27 }
 0x1f2   : > { %vm660_vm10 = vmor %vm658_vm9, %vm659_vm8 }
 0x1f3   : > { %v654_v29 = vmul.f32 %v844_v27, %v653_v28 }
 0x1f5   : > { %v655_v30 = vmul.f32 0.5, %v654_v29 }
 0x1f7   : > { %v656_v32 = vsub.f32 1.5, %v655_v30 }
 0x1f9   : > { %v657_v33 = vmul.f32 %v844_v27, %v656_v32 }
 0x1fb   : > { %v661_v36 = vsel %vm660_vm10, %v844_v27, %v657_v33 }
 0x1fc   : > { %v662_v37 = vmul.f32 %v661_v36, %v650_v34 }
 0x1fe   : > { %v667_v38 = vadd.f32 %v840_v35, %v662_v37 }
 0x200   : > { %v668_v39 = vmul.f32 %v667_v38, %v667_v38 }
 0x202   : > { %669 = vadd.xlane.f32.xlu0 %v668_v39 }
 0x275   : > { %v670_v40 = vpop.xlane.xlu0 %669 }
 0x276   : > { %v671_v41 = vmax.f32 %v670_v40, 1e-24 }
 0x278   : > { %845 = vrsqrt.f32 %v671_v41  ;;  %vm678_vm12 = vweird.f32 %v671_v41 }
 0x27e   : > { %v846_v42 = vpop.eup %845 }
 0x27f   : > { %v673_v43 = vmul.f32 %v846_v42, %v671_v41  ;;  %vm679_vm11 = vweird.f32 %v846_v42 }
 0x280   : > { %vm680_vm13 = vmor %vm678_vm12, %vm679_vm11 }
 0x281   : > { %v674_v44 = vmul.f32 %v846_v42, %v673_v43 }
 0x283   : > { %v675_v45 = vmul.f32 0.5, %v674_v44 }
 0x285   : > { %v676_v46 = vsub.f32 1.5, %v675_v45 }
 0x287   : > { %v677_v47 = vmul.f32 %v846_v42, %v676_v46 }
 0x289   : > { %v681_v48 = vsel %vm680_vm13, %v846_v42, %v677_v47 }
 0x28a   : > { %v682_v49 = vmul.f32 %v681_v48, %v667_v38 }
 0x28c   : > { %683 = vst [vmem:[#allocation8] sm:$0xff] %v682_v49 }
 0x28d PF: > { %p800_p13 = scmp.eq.s32.totalorder %s1001_s27, 1  ;;  %s944_s30 = smov [#allocation8]  }
 0x28e   : > { %s690_s11 = sshll.u32 %s944_s30, 4  ;;  %s692_s14 = sshll.u32 %s1102_s7, 4  ;;  %s691_s11 = int_to_ptr.vmem [resolvable:$true] %s690_s11  ;;  %s693_s14 = int_to_ptr.hbm [resolvable:$true] %s692_s14 }
 0x28f   : > { %791 = dma.vmem_to_hbm [thread:$0]  (%p800_p13), %s691_s11, 128, %s693_s14, [#allocation7]  }
 0x290   : > { %922 = dma.done.wait (%p800_p13), [#allocation7], 128  }
 0x291   : > { %924 = vsyncadd (%p800_p13), [#allocation7], 4294967168 }
 0x292 PF: > { %p16_p0 = scmp.ge.s32.totalorder %s1004_s28, 4   ;;  %s1105_s24 = smov %s931_s25 }
 0x293   : > { %s1106_s25 = smov %s1014_s8  ;;  %s1107_s26 = smov %s1004_s28 }
 0x294   :  { %18 = sbr.rel (!%p16_p0) target bundleno = 3 (0x3), region = 177 }
 0x299   :  { %706 = vsyncpa [#allocation6], 1 }
 0x29a   :  { %708 = vsyncpa [#allocation6 + $0x1], 1 }
 0x29b   :  { %709 = vsyncpa [#allocation7], 1 }
 0x29c   :  { %711 = vsyncpa [#allocation7 + $0x1], 1 }

</bundles_post_ra>
